<compile_context>
chip_gen: v6e
topology: v6e:2x2x1
jax: 0.10.0
libtpu: 0.0.40
codegen_flags: <defaults>
</compile_context>

<pallas_src>
import functools
import math

import jax
import jax.numpy as jnp
from jax.experimental import pallas as pl
from jax.experimental.pallas import tpu as pltpu

LANE = 128      # vreg lane width
SUBLANE = 8     # f32 sublane height


def _round_up(x, m):
    return (x + m - 1) // m * m


def _bucket_batch(b):
    """Bucket the padded batch size to {8, 16, 32, ...} so the Pallas kernel
    shape (and its compilation) is shared across nearby batch sizes."""
    return max(SUBLANE, pl.next_power_of_2(b))


# ----------------------------------------------------------------------------
# Kernel
# ----------------------------------------------------------------------------
def _actor_kernel(n_ref, x_ref, w1_ref, w23_ref, p_ref, out_ref, *, f1p, f2p, ap):
    """Single-block forward pass.

    n_ref   : SMEM [1, 1] int32             real (unpadded) batch size
    x_ref   : VMEM [Bp, S] f32               zero-padded input rows
    w1_ref  : VMEM [S, F1p] bf16             lane-padded fc1 weight
    w23_ref : VMEM [max(F1p,F2p), F2p+Ap] bf16   (w2 | w3) packed along lanes
    p_ref   : VMEM [8, W] f32                rows: 0=b1 1=gamma 2=beta 3=b2 4=b3
    out_ref : VMEM [Bp, Ap] f32              lane-dense output slab
    """
    n = n_ref[0, 0].astype(jnp.float32)
    bp = out_ref.shape[0]
    n_pad = jnp.float32(bp) - n

    # ---- fc1 + relu (bf16 operands on the MXU, f32 accumulate) ----
    x = x_ref[...].astype(jnp.bfloat16)
    b1 = p_ref[0:1, :f1p]
    h1 = jnp.dot(x, w1_ref[...], preferred_element_type=jnp.float32)
    h1 = jnp.maximum(h1 + b1, 0.0)                              # [Bp, F1p]

    # ---- BatchNorm1d (training mode, biased batch stats over real rows) ----
    # Padded input rows are all-zero, so each contributes exactly relu(b1) to
    # h1; correct the fused sums analytically instead of masking [Bp, F1p].
    pad_row = jnp.maximum(b1, 0.0)                              # [1, F1p]
    s1 = jnp.sum(h1, axis=0, keepdims=True) - n_pad * pad_row
    s2 = jnp.sum(h1 * h1, axis=0, keepdims=True) - n_pad * pad_row * pad_row
    inv_n = 1.0 / n
    mean = s1 * inv_n
    var = jnp.maximum(s2 * inv_n - mean * mean, 0.0)            # clamp vs f32 rounding
    h1n = (h1 - mean) * jax.lax.rsqrt(var + 1e-5)
    h1n = h1n * p_ref[1:2, :f1p] + p_ref[2:3, :f1p]             # gamma, beta

    # ---- fc2 + relu ----
    h2 = jnp.dot(h1n.astype(jnp.bfloat16), w23_ref[:f1p, :f2p],
                 preferred_element_type=jnp.float32)
    h2 = jnp.maximum(h2 + p_ref[3:4, :f2p], 0.0)                # [Bp, F2p]

    # ---- fc3 + tanh (lane-dense store) ----
    o = jnp.dot(h2.astype(jnp.bfloat16), w23_ref[:f2p, f2p:],
                preferred_element_type=jnp.float32)
    out_ref[...] = jnp.tanh(o + p_ref[4:5, :ap])                # [Bp, Ap]


@functools.lru_cache(maxsize=None)
def _build_actor_call(bp, f1p, f2p, ap):
    """Construct (and cache) the pallas_call for one bucketed shape."""
    kernel = functools.partial(_actor_kernel, f1p=f1p, f2p=f2p, ap=ap)
    return pl.pallas_call(
        kernel,
        out_shape=jax.ShapeDtypeStruct((bp, ap), jnp.float32),
        in_specs=[
            pl.BlockSpec(memory_space=pltpu.MemorySpace.SMEM),  # n (runtime scalar)
            pl.BlockSpec(memory_space=pltpu.MemorySpace.VMEM),  # x
            pl.BlockSpec(memory_space=pltpu.MemorySpace.VMEM),  # w1
            pl.BlockSpec(memory_space=pltpu.MemorySpace.VMEM),  # w2|w3 slab
            pl.BlockSpec(memory_space=pltpu.MemorySpace.VMEM),  # bias/BN slab
        ],
        out_specs=pl.BlockSpec(memory_space=pltpu.MemorySpace.VMEM),
    )


# ----------------------------------------------------------------------------
# Parameter packing (done once, reused across calls)
# ----------------------------------------------------------------------------
def prepare_actor_params(params, state_size, fc1_units, fc2_units, action_size):
    f1p = _round_up(fc1_units, LANE)
    f2p = _round_up(fc2_units, LANE)
    ap = _round_up(action_size, LANE)
    w = max(f1p, f2p, ap)
    r23 = max(f1p, f2p)

    w1 = jnp.zeros((state_size, f1p), jnp.bfloat16)
    w1 = w1.at[:, :fc1_units].set(params["w1"].astype(jnp.bfloat16))

    # w2 and w3 packed along the lane axis into a single bf16 slab (one DMA).
    w23 = jnp.zeros((r23, f2p + ap), jnp.bfloat16)
    w23 = w23.at[:fc1_units, :fc2_units].set(params["w2"].astype(jnp.bfloat16))
    w23 = w23.at[:fc2_units, f2p:f2p + action_size].set(
        params["w3"].astype(jnp.bfloat16))

    slab = jnp.zeros((SUBLANE, w), jnp.float32)
    slab = slab.at[0, :fc1_units].set(params["b1"].reshape(-1))
    slab = slab.at[1, :fc1_units].set(params["gamma"].reshape(-1))
    slab = slab.at[2, :fc1_units].set(params["beta"].reshape(-1))
    slab = slab.at[3, :fc2_units].set(params["b2"].reshape(-1))
    slab = slab.at[4, :action_size].set(params["b3"].reshape(-1))

    return {
        "w1": w1, "w23": w23, "slab": slab,
        "dims": (state_size, fc1_units, fc2_units, action_size, f1p, f2p, ap),
    }


# ----------------------------------------------------------------------------
# Forward wrapper (fully jitted: pad + kernel + slice = one dispatch)
# ----------------------------------------------------------------------------
@functools.partial(jax.jit, static_argnames=("dims",))
def _actor_forward_jit(state, w1, w23, slab, dims):
    _, _, _, action_size, f1p, f2p, ap = dims
    if state.ndim == 1:                       # mirror torch.unsqueeze(state, 0)
        state = state[None, :]
    state = state.astype(jnp.float32)

    b = state.shape[0]
    bp = _bucket_batch(b)
    if bp != b:
        state = jnp.pad(state, ((0, bp - b), (0, 0)))

    n = jnp.full((1, 1), b, jnp.int32)        # runtime SMEM scalar for the kernel
    call = _build_actor_call(bp, f1p, f2p, ap)
    out = call(n, state, w1, w23, slab)
    return out[:b, :action_size]


def actor_forward(state, packed):
    """state: [B, state_size] (or [state_size]) -> [B, action_size] f32."""
    return _actor_forward_jit(state, packed["w1"], packed["w23"], packed["slab"],
                              packed["dims"])


# ----------------------------------------------------------------------------
# Init + reference
# ----------------------------------------------------------------------------
def init_actor_params(key, state_size, fc1_units, fc2_units, action_size):
    """Matches the PyTorch module's reset_parameters():
       fc1/fc2 weights ~ U(-1/sqrt(fan_in), 1/sqrt(fan_in)), fc3 ~ U(-3e-3, 3e-3),
       biases keep the PyTorch Linear default, BN gamma=1 / beta=0."""
    ks = jax.random.split(key, 6)

    def u(k, shape, lim):
        return jax.random.uniform(k, shape, jnp.float32, minval=-lim, maxval=lim)

    lim1 = 1.0 / math.sqrt(state_size)
    lim2 = 1.0 / math.sqrt(fc1_units)
    lim3 = 1.0 / math.sqrt(fc2_units)

    return {
        # stored as [in, out] (transposed vs. PyTorch's [out, in])
        "w1": u(ks[0], (state_size, fc1_units), lim1),
        "b1": u(ks[1], (1, fc1_units), lim1),
        "gamma": jnp.ones((1, fc1_units), jnp.float32),
        "beta": jnp.zeros((1, fc1_units), jnp.float32),
        "w2": u(ks[2], (fc1_units, fc2_units), lim2),
        "b2": u(ks[3], (1, fc2_units), lim2),
        "w3": u(ks[4], (fc2_units, action_size), 0.003),
        "b3": u(ks[5], (1, action_size), lim3),
    }


def actor_reference(state, params):
    """Pure-JAX reference mirroring the kernel numerics (bf16 matmul operands,
       f32 accumulation / elementwise)."""
    if state.ndim == 1:
        state = state[None, :]

    def mm(a, b):
        return jnp.dot(a.astype(jnp.bfloat16), b.astype(jnp.bfloat16),
                       preferred_element_type=jnp.float32)

    h1 = jnp.maximum(mm(state, params["w1"]) + params["b1"], 0.0)
    mean = jnp.mean(h1, axis=0, keepdims=True)
    var = jnp.mean(h1 * h1, axis=0, keepdims=True) - mean * mean
    var = jnp.maximum(var, 0.0)
    h1n = (h1 - mean) * jax.lax.rsqrt(var + 1e-5)
    h1n = h1n * params["gamma"] + params["beta"]
    h2 = jnp.maximum(mm(h1n, params["w2"]) + params["b2"], 0.0)
    return jnp.tanh(mm(h2, params["w3"]) + params["b3"])


if __name__ == "__main__":
    # Small shapes consistent with the module's forward.
    state_size = 16
    fc1_units = 32
    fc2_units = 32
    action_size = 4

    key = jax.random.PRNGKey(0)
    k_params, k_state = jax.random.split(key)

    params = init_actor_params(k_params, state_size, fc1_units, fc2_units, action_size)
    packed = prepare_actor_params(params, state_size, fc1_units, fc2_units, action_size)

    # Case 1: batch a multiple of the sublane height.
    state8 = jax.random.normal(k_state, (8, state_size), jnp.float32)
    out8 = jax.block_until_ready(actor_forward(state8, packed))
    ref8 = actor_reference(state8, params)
    assert out8.shape == (8, action_size)
    assert jnp.allclose(out8, ref8, atol=1e-2, rtol=1e-2), "mismatch (B=8)"
    assert bool(jnp.all(jnp.isfinite(out8))), "non-finite outputs (B=8)"

    # Case 2: ragged batch (exercises padding bucket + SMEM batch-size scalar
    # + analytic BN-stat correction). Same kernel compilation as B=8.
    state5 = state8[:5]
    out5 = jax.block_until_ready(actor_forward(state5, packed))
    ref5 = actor_reference(state5, params)
    assert out5.shape == (5, action_size)
    assert jnp.allclose(out5, ref5, atol=1e-2, rtol=1e-2), "mismatch (B=5)"
    assert bool(jnp.all(jnp.isfinite(out5))), "non-finite outputs (B=5)"

    print("KERNEL_OK")
</pallas_src>

<mosaic_0001>
module attributes {stable_mosaic.version = 11 : i64} {
  func.func @_actor_kernel(%arg0: memref<1x1xi32, #tpu.memory_space<smem>>, %arg1: memref<8x16xf32, #tpu.memory_space<vmem>>, %arg2: memref<16x128xbf16, #tpu.memory_space<vmem>>, %arg3: memref<128x256xbf16, #tpu.memory_space<vmem>>, %arg4: memref<8x128xf32, #tpu.memory_space<vmem>>, %arg5: memref<8x128xf32, #tpu.memory_space<vmem>>) attributes {dimension_semantics = [], scalar_prefetch = 0 : i64, scratch_operands = 0 : i64, tpu.core_type = #tpu.core_type<tc>} {
    %c0 = arith.constant 0 : index
    %c0_0 = arith.constant 0 : index
    %0 = memref.load %arg0[%c0, %c0_0] : memref<1x1xi32, #tpu.memory_space<smem>>
    %1 = arith.sitofp %0 : i32 to f32
    %cst = arith.constant 8.000000e+00 : f32
    %2 = arith.subf %cst, %1 : f32
    %c0_1 = arith.constant 0 : index
    %c0_2 = arith.constant 0 : index
    %3 = vector.load %arg1[%c0_1, %c0_2] : memref<8x16xf32, #tpu.memory_space<vmem>>, vector<8x16xf32>
    %4 = arith.truncf %3 : vector<8x16xf32> to vector<8x16xbf16>
    %c0_3 = arith.constant 0 : index
    %c0_4 = arith.constant 0 : index
    %5 = vector.load %arg4[%c0_3, %c0_4] : memref<8x128xf32, #tpu.memory_space<vmem>>, vector<1x128xf32>
    %c0_5 = arith.constant 0 : index
    %c0_6 = arith.constant 0 : index
    %6 = vector.load %arg2[%c0_5, %c0_6] : memref<16x128xbf16, #tpu.memory_space<vmem>>, vector<16x128xbf16>
    %cst_7 = arith.constant dense<0.000000e+00> : vector<8x128xf32>
    %7 = tpu.matmul %4, %6, %cst_7 {dimension_numbers = #tpu.dot_dimension_numbers<[1], [0], [0], [1], [0, 0, 1, 1], [], []>} : vector<8x16xbf16>, vector<16x128xbf16>, vector<8x128xf32> -> vector<8x128xf32>
    %8 = vector.broadcast %5 : vector<1x128xf32> to vector<8x128xf32>
    %9 = arith.addf %7, %8 : vector<8x128xf32>
    %cst_8 = arith.constant 0.000000e+00 : f32
    %10 = vector.broadcast %cst_8 : f32 to vector<8x128xf32>
    %11 = arith.maximumf %9, %10 : vector<8x128xf32>
    %cst_9 = arith.constant 0.000000e+00 : f32
    %12 = vector.broadcast %cst_9 : f32 to vector<1x128xf32>
    %13 = arith.maximumf %5, %12 : vector<1x128xf32>
    %cst_10 = arith.constant dense<0.000000e+00> : vector<128xf32>
    %14 = vector.multi_reduction <add>, %11, %cst_10 [0] : vector<8x128xf32> to vector<128xf32>
    %15 = vector.shape_cast %14 : vector<128xf32> to vector<1x128xf32>
    %16 = vector.broadcast %2 : f32 to vector<1x128xf32>
    %17 = arith.mulf %16, %13 : vector<1x128xf32>
    %18 = arith.subf %15, %17 : vector<1x128xf32>
    %19 = arith.mulf %11, %11 : vector<8x128xf32>
    %cst_11 = arith.constant dense<0.000000e+00> : vector<128xf32>
    %20 = vector.multi_reduction <add>, %19, %cst_11 [0] : vector<8x128xf32> to vector<128xf32>
    %21 = vector.shape_cast %20 : vector<128xf32> to vector<1x128xf32>
    %22 = vector.broadcast %2 : f32 to vector<1x128xf32>
    %23 = arith.mulf %22, %13 : vector<1x128xf32>
    %24 = arith.mulf %23, %13 : vector<1x128xf32>
    %25 = arith.subf %21, %24 : vector<1x128xf32>
    %cst_12 = arith.constant 1.000000e+00 : f32
    %26 = arith.divf %cst_12, %1 : f32
    %27 = vector.broadcast %26 : f32 to vector<1x128xf32>
    %28 = arith.mulf %18, %27 : vector<1x128xf32>
    %29 = vector.broadcast %26 : f32 to vector<1x128xf32>
    %30 = arith.mulf %25, %29 : vector<1x128xf32>
    %31 = arith.mulf %28, %28 : vector<1x128xf32>
    %32 = arith.subf %30, %31 : vector<1x128xf32>
    %cst_13 = arith.constant 0.000000e+00 : f32
    %33 = vector.broadcast %cst_13 : f32 to vector<1x128xf32>
    %34 = arith.maximumf %32, %33 : vector<1x128xf32>
    %35 = vector.broadcast %28 : vector<1x128xf32> to vector<8x128xf32>
    %36 = arith.subf %11, %35 : vector<8x128xf32>
    %cst_14 = arith.constant 9.99999974E-6 : f32
    %37 = vector.broadcast %cst_14 : f32 to vector<1x128xf32>
    %38 = arith.addf %34, %37 : vector<1x128xf32>
    %39 = math.rsqrt %38 : vector<1x128xf32>
    %40 = vector.broadcast %39 : vector<1x128xf32> to vector<8x128xf32>
    %41 = arith.mulf %36, %40 : vector<8x128xf32>
    %c1 = arith.constant 1 : index
    %c0_15 = arith.constant 0 : index
    %42 = vector.load %arg4[%c1, %c0_15] : memref<8x128xf32, #tpu.memory_space<vmem>>, vector<1x128xf32>
    %43 = vector.broadcast %42 : vector<1x128xf32> to vector<8x128xf32>
    %44 = arith.mulf %41, %43 : vector<8x128xf32>
    %c2 = arith.constant 2 : index
    %c0_16 = arith.constant 0 : index
    %45 = vector.load %arg4[%c2, %c0_16] : memref<8x128xf32, #tpu.memory_space<vmem>>, vector<1x128xf32>
    %46 = vector.broadcast %45 : vector<1x128xf32> to vector<8x128xf32>
    %47 = arith.addf %44, %46 : vector<8x128xf32>
    %48 = arith.truncf %47 : vector<8x128xf32> to vector<8x128xbf16>
    %c0_17 = arith.constant 0 : index
    %c0_18 = arith.constant 0 : index
    %49 = vector.load %arg3[%c0_17, %c0_18] : memref<128x256xbf16, #tpu.memory_space<vmem>>, vector<128x128xbf16>
    %cst_19 = arith.constant dense<0.000000e+00> : vector<8x128xf32>
    %50 = tpu.matmul %48, %49, %cst_19 {dimension_numbers = #tpu.dot_dimension_numbers<[1], [0], [0], [1], [0, 0, 1, 1], [], []>} : vector<8x128xbf16>, vector<128x128xbf16>, vector<8x128xf32> -> vector<8x128xf32>
    %c3 = arith.constant 3 : index
    %c0_20 = arith.constant 0 : index
    %51 = vector.load %arg4[%c3, %c0_20] : memref<8x128xf32, #tpu.memory_space<vmem>>, vector<1x128xf32>
    %52 = vector.broadcast %51 : vector<1x128xf32> to vector<8x128xf32>
    %53 = arith.addf %50, %52 : vector<8x128xf32>
    %cst_21 = arith.constant 0.000000e+00 : f32
    %54 = vector.broadcast %cst_21 : f32 to vector<8x128xf32>
    %55 = arith.maximumf %53, %54 : vector<8x128xf32>
    %56 = arith.truncf %55 : vector<8x128xf32> to vector<8x128xbf16>
    %c0_22 = arith.constant 0 : index
    %c128 = arith.constant 128 : index
    %57 = vector.load %arg3[%c0_22, %c128] : memref<128x256xbf16, #tpu.memory_space<vmem>>, vector<128x128xbf16>
    %cst_23 = arith.constant dense<0.000000e+00> : vector<8x128xf32>
    %58 = tpu.matmul %56, %57, %cst_23 {dimension_numbers = #tpu.dot_dimension_numbers<[1], [0], [0], [1], [0, 0, 1, 1], [], []>} : vector<8x128xbf16>, vector<128x128xbf16>, vector<8x128xf32> -> vector<8x128xf32>
    %c4 = arith.constant 4 : index
    %c0_24 = arith.constant 0 : index
    %59 = vector.load %arg4[%c4, %c0_24] : memref<8x128xf32, #tpu.memory_space<vmem>>, vector<1x128xf32>
    %60 = vector.broadcast %59 : vector<1x128xf32> to vector<8x128xf32>
    %61 = arith.addf %58, %60 : vector<8x128xf32>
    %62 = math.tanh %61 : vector<8x128xf32>
    %c0_25 = arith.constant 0 : index
    %c0_26 = arith.constant 0 : index
    %63 = vector.load %arg5[%c0_25, %c0_26] : memref<8x128xf32, #tpu.memory_space<vmem>>, vector<8x128xf32>
    tpu.vector_store %arg5[%c0_25, %c0_26], %62 {strides = array<i32>} : memref<8x128xf32, #tpu.memory_space<vmem>>, vector<8x128xf32>,
    return
  }
}

</mosaic_0001>

<bundles_post_ra>
// kernel: _actor_forward_jit.1
= control target key start
LH: loop header
LB: loop body
LE: loop exit
PB: predicated region body
PF: predicated region fallthrough
CT: control target
= control target key end

     0   :  { %11 = vsyncpa [#allocation4], 0  ;;  %s713_s0 = inlined_call_operand.<no memory space> [shape: s32[1,1], index: 0, kind: input, shape index: {}]   ;;  %s714_s1 = inlined_call_operand.hbm [shape: f32[8,16], index: 1, kind: input, shape index: {}]   ;;  %s715_s2 = inlined_call_operand.hbm [shape: bf16[16,128], index: 2, kind: input, shape index: {}]   ;;  %s716_s3 = inlined_call_operand.hbm [shape: bf16[128,256], index: 3, kind: input, shape index: {}]   ;;  %s717_s4 = inlined_call_operand.hbm [shape: f32[8,128], index: 4, kind: input, shape index: {}]   ;;  %s718_s5 = inlined_call_operand.vmem [shape: f32[8,128], index: 5, kind: output, shape index: {}]  }
   0x1   :  { %12 = vsyncpa [#allocation6], 0 }
   0x2   :  { %13 = vsyncpa [#allocation9], 0  ;;  %s627_s18 = smov [#allocation5]  }
   0x3   :  { %s31_s19 = sshll.u32 %s627_s18, 4  ;;  %s32_s19 = int_to_ptr.vmem [resolvable:$true] %s31_s19 }
   0x4   :  { %s549_s20 = scalar_lea.vmem %s32_s19, 128  ;;  %p554_p1 = scmp.lt.s32.totalorder %s32_s19, %s32_s19 }
   0x5   :  { %p550_p0 = scmp.ne.s32.totalorder %s32_s19, %s549_s20  ;;  %p555_p2 = scmp.lt.s32.totalorder %s549_s20, %s549_s20 }
   0x7   :  { %p556_p3 = por %p555_p2, %p554_p1 }
   0x9   :  { %p557_p4 = pnand %p556_p3, %p550_p0 }
   0xb   :  { %560 = shalt.err (!%p557_p4)
}
   0xc   :  { %s628_s21 = smov 64   ;;  %s629_s22 = smov 4  }
   0xd   :  { %37 = dma.hbm_to_vmem [thread:$0]  %s715_s2, 128, %s32_s19, [#allocation6], %s628_s21, %s628_s21, %s629_s22  }
   0xe   :  { %s630_s25 = smov [#allocation3]   ;;  %s631_s27 = smov [#allocation7]  }
   0xf   :  { %s22_s26 = sshll.u32 %s630_s25, 4  ;;  %s43_s28 = sshll.u32 %s631_s27, 4  ;;  %s23_s26 = int_to_ptr.vmem [resolvable:$true] %s22_s26  ;;  %s44_s28 = int_to_ptr.vmem [resolvable:$true] %s43_s28 }
  0x10   :  { %s569_s29 = scalar_lea.vmem %s23_s26, 128  ;;  %p574_p6 = scmp.lt.s32.totalorder %s23_s26, %s23_s26 }
  0x11   :  { %p570_p5 = scmp.ne.s32.totalorder %s23_s26, %s569_s29  ;;  %p575_p7 = scmp.lt.s32.totalorder %s569_s29, %s569_s29 }
  0x13   :  { %p576_p8 = por %p575_p7, %p574_p6 }
  0x15   :  { %p577_p9 = pnand %p576_p8, %p570_p5 }
  0x17   :  { %580 = shalt.err (!%p577_p9)
}
  0x18   :  { %25 = dma.hbm_to_vmem [thread:$0]  %s714_s1, 128, %s23_s26, [#allocation4]  }
  0x19   :  { %s589_s7 = scalar_lea.vmem %s44_s28, 2048  ;;  %p594_p11 = scmp.lt.s32.totalorder %s44_s28, %s44_s28 }
  0x1a   :  { %p590_p10 = scmp.ne.s32.totalorder %s44_s28, %s589_s7  ;;  %p595_p12 = scmp.lt.s32.totalorder %s589_s7, %s589_s7 }
  0x1c   :  { %p596_p13 = por %p595_p12, %p594_p11 }
  0x1e   :  { %p597_p0 = pnand %p596_p13, %p590_p10 }
  0x20   :  { %600 = shalt.err (!%p597_p0)
}
  0x21   :  { %s632_s2 = smov 128   ;;  %s633_s8 = smov 8  }
  0x22   :  { %49 = dma.hbm_to_vmem [thread:$0]  %s716_s3, 2048, %s44_s28, [#allocation6], %s632_s2, %s632_s2, %s633_s8  }
  0x23   :  { %s634_s11 = smov [#allocation8]  }
  0x24   :  { %s56_s12 = sshll.u32 %s634_s11, 4  ;;  %s57_s12 = int_to_ptr.vmem [resolvable:$true] %s56_s12 }
  0x25   :  { %s609_s13 = scalar_lea.vmem %s57_s12, 128  ;;  %p614_p2 = scmp.lt.s32.totalorder %s57_s12, %s57_s12 }
  0x26   :  { %p610_p1 = scmp.ne.s32.totalorder %s57_s12, %s609_s13  ;;  %p615_p3 = scmp.lt.s32.totalorder %s609_s13, %s609_s13 }
  0x28   :  { %p616_p4 = por %p615_p3, %p614_p2 }
  0x2a   :  { %p617_p5 = pnand %p616_p4, %p610_p1 }
  0x2c   :  { %620 = shalt.err (!%p617_p5)
}
  0x2d   :  { %59 = dma.hbm_to_vmem [thread:$0]  %s717_s4, 128, %s57_s12, [#allocation9]  }
  0x2e   :  { %621 = dma.done.wait [#allocation4], 128  }
  0x2f   :  { %622 = vsyncadd [#allocation4], 4294967168 }
  0x30   :  { %623 = dma.done.wait [#allocation6], 2176  }
  0x31   :  { %624 = vsyncadd [#allocation6], 4294965120 }
  0x32   :  { %625 = dma.done.wait [#allocation9], 128  }
  0x33   :  { %626 = vsyncadd [#allocation9], 4294967168  ;;  %s74_s16 = scvt.s32.f32 %s713_s0  ;;  %v635_v0 = vmov 0.0   ;;  %vm636_vm0 = vmmov 0   ;;  %v518_v2 = vld [vmem:[#allocation5] sm:$0xff]   ;;  %v76_v3 = vld [vmem:[#allocation3] sm:$0xff]  ;;  %v81_v20 = vlaneseq }
  0x34   :  { %460 = vmatprep.subr.bf16.mxu0 %v635_v0  ;;  %462 = vmatprep.mubr.msk.bf16.mxu0 %vm636_vm0, %v635_v0  ;;  %vm91_vm1 = vcmask 130048   ;;  %v77_v4 = vpack.c.bf16 %v76_v3, %v76_v3  ;;  %v519_v6 = vld [vmem:[#allocation7 + $0x70] ss:$8 sps:$4 sm:$0xff]   ;;  %v520_v7 = vld [vmem:[#allocation7 + $0x60] ss:$8 sps:$4 sm:$0xff]  }
  0x35   :  { %v155_v1 = vstv %s74_s16  ;;  %466 = vmatprep.subr.bf16.mxu1 %v635_v0  ;;  %482 = vmatprep.mubr.msk.bf16.mxu1 %vm636_vm0, %v635_v0  ;;  %v521_v8 = vld [vmem:[#allocation7 + $0x50] ss:$8 sps:$4 sm:$0xff]   ;;  %v522_v9 = vld [vmem:[#allocation7 + $0x40] ss:$8 sps:$4 sm:$0xff]   ;;  %v527_v14 = vld [vmem:[#allocation7 + $0x74] ss:$8 sps:$4 sm:$0xff]  }
  0x36   :  { %535 = vrcp.f32 %v155_v1  ;;  %461 = vmatpush3.bf16.msra.mxu0 %v518_v2  ;;  %467 = vmatpush3.bf16.msra.mxu1 %v519_v6  ;;  %v523_v10 = vld [vmem:[#allocation7 + $0x30] ss:$8 sps:$4 sm:$0xff]   ;;  %v524_v11 = vld [vmem:[#allocation7 + $0x20] ss:$8 sps:$4 sm:$0xff]   ;;  %v528_v15 = vld [vmem:[#allocation7 + $0x64] ss:$8 sps:$4 sm:$0xff]  }
  0x37   :  { %486 = vmatprep.subr.bf16.mxu0 %v635_v0  ;;  %468 = vmatprep.subr.bf16.mxu1 %v635_v0  ;;  %v525_v12 = vld [vmem:[#allocation7 + $0x10] ss:$8 sps:$4 sm:$0xff]   ;;  %v526_v13 = vld [vmem:[#allocation7] ss:$8 sps:$4 sm:$0xff]   ;;  %v529_v16 = vld [vmem:[#allocation7 + $0x54] ss:$8 sps:$4 sm:$0xff]  }
  0x38   :  { %v530_v17 = vld [vmem:[#allocation7 + $0x44] ss:$8 sps:$4 sm:$0xff]   ;;  %v531_v18 = vld [vmem:[#allocation7 + $0x34] ss:$8 sps:$4 sm:$0xff]   ;;  %v82_v21 = vshrl.u32 %v81_v20, 7  ;;  %s75_s20 = ssub.f32 8.0, %s74_s16 }
  0x39   :  { %463 = vmatmul.mubr.msk.bf16.vlgmr.msra.gmra.mxu0 %vm91_vm1, %v77_v4  ;;  %v532_v19 = vld [vmem:[#allocation7 + $0x24] ss:$8 sps:$4 sm:$0xff]   ;;  %v78_v23 = vld [vmem:[#allocation8] sm:$0x1]  ;;  %v420_v61 = vld [vmem:[#allocation8 + $0x1] ss:$0 sm:$0xff] }
  0x3a   :  { %502 = vmatprep.mubr.msk.bf16.mxu0 %vm636_vm0, %v635_v0  ;;  %469 = vmatpush3.bf16.msra.mxu1 %v520_v7  ;;  %v83_v22 = vsub.s32 0, %v82_v21  ;;  %v136_v33 = vmax.f32 %v78_v23, 0.0  ;;  %v143_v36 = vstv %s75_s20  ;;  %v421_v63 = vld [vmem:[#allocation8 + $0x2] ss:$0 sm:$0xff]  ;;  %v533_v4 = vld [vmem:[#allocation7 + $0x14] ss:$8 sps:$4 sm:$0xff]  }
  0x3b   :  { %470 = vmatprep.subr.bf16.mxu1 %v635_v0  ;;  %487 = vmatpush3.bf16.msra.mxu0 %v527_v14  ;;  %v422_v6 = vld [vmem:[#allocation8 + $0x3] ss:$0 sm:$0xff]  ;;  %v431_v14 = vld [vmem:[#allocation8 + $0x4] ss:$0 sm:$0xff] }
  0x3c   :  { %488 = vmatprep.subr.bf16.mxu0 %v635_v0  ;;  %v84_v24 = vrot.slane %v78_v23, %v83_v22  ;;  %v144_v40 = vmul.f32 %v143_v36, %v136_v33 }
  0x3e   :  { %471 = vmatpush3.bf16.msra.mxu1 %v521_v8  ;;  %v153_v46 = vmul.f32 %v144_v40, %v136_v33 }
  0x3f   :  { %472 = vmatprep.subr.bf16.mxu1 %v635_v0  ;;  %489 = vmatpush3.bf16.msra.mxu0 %v528_v15 }
  0x40   :  { %490 = vmatprep.subr.bf16.mxu0 %v635_v0 }
  0x42   :  { %473 = vmatpush3.bf16.msra.mxu1 %v522_v9 }
  0x43   :  { %v536_v5 = vpop.eup %535  ;;  %474 = vmatprep.subr.bf16.mxu1 %v635_v0  ;;  %491 = vmatpush3.bf16.msra.mxu0 %v529_v16 }
  0x44   :  { %506 = vpush %v536_v5  ;;  %492 = vmatprep.subr.bf16.mxu0 %v635_v0  ;;  %v534_v5 = vld [vmem:[#allocation7 + $0x4] ss:$8 sps:$4 sm:$0xff]  }
  0x46   :  { %475 = vmatpush3.bf16.msra.mxu1 %v523_v10 }
  0x47   :  { %476 = vmatprep.subr.bf16.mxu1 %v635_v0  ;;  %493 = vmatpush3.bf16.msra.mxu0 %v530_v17 }
  0x48   :  { %494 = vmatprep.subr.bf16.mxu0 %v635_v0 }
  0x4a   :  { %477 = vmatpush3.bf16.msra.mxu1 %v524_v11 }
  0x4b   :  { %478 = vmatprep.subr.bf16.mxu1 %v635_v0  ;;  %495 = vmatpush3.bf16.msra.mxu0 %v531_v18 }
  0x4c   :  { %496 = vmatprep.subr.bf16.mxu0 %v635_v0 }
  0x4e   :  { %479 = vmatpush3.bf16.msra.mxu1 %v525_v12 }
  0x4f   :  { %480 = vmatprep.subr.bf16.mxu1 %v635_v0  ;;  %497 = vmatpush3.bf16.msra.mxu0 %v532_v19 }
  0x50   :  { %498 = vmatprep.subr.bf16.mxu0 %v635_v0 }
  0x52   :  { %481 = vmatpush3.bf16.msra.mxu1 %v526_v13 }
  0x53   :  { %499 = vmatpush3.bf16.msra.mxu0 %v533_v4 }
  0x54   :  { %500 = vmatprep.subr.bf16.mxu0 %v635_v0 }
  0x57   :  { %501 = vmatpush3.bf16.msra.mxu0 %v534_v5 }
  0x75   :  { %s507_s21 = spop %506 }
  0x76   :  { %v158_v47 = vstv %s507_s21 }
  0xf9   :  { %v129_v25 = vpop.f32.mrf.mxu0 }
  0xfa   :  { %v130_v26 = vadd.f32 %v129_v25, %v84_v24 }
  0xfb   :  { %v464_v27 = vpop.f32.mrf.mxu0 }
  0xfc   :  { %v135_v28 = vmax.f32 %v130_v26, 0.0 }
  0xfd   :  { %v132_v29 = vpop.f32.mrf.mxu0 }
  0xfe   :  { %v137_v30 = vrot.slane %v135_v28, 4  ;;  %v146_v31 = vmul.f32 %v135_v28, %v135_v28 }
  0xff   :  { %v465_v32 = vpop.f32.mrf.mxu0 }
 0x100   :  { %v138_v34 = vadd.f32 %v137_v30, %v135_v28  ;;  %v147_v35 = vrot.slane %v146_v31, 4 }
 0x102   :  { %v139_v37 = vrot.slane %v138_v34, 2  ;;  %v148_v38 = vadd.f32 %v147_v35, %v146_v31 }
 0x104   :  { %v140_v39 = vadd.f32 %v139_v37, %v138_v34  ;;  %v149_v41 = vrot.slane %v148_v38, 2 }
 0x106   :  { %v141_v42 = vrot.slane %v140_v39, 1  ;;  %v150_v43 = vadd.f32 %v149_v41, %v148_v38 }
 0x108   :  { %v142_v44 = vadd.f32 %v141_v42, %v140_v39  ;;  %v151_v45 = vrot.slane %v150_v43, 1 }
 0x10a   :  { %v145_v48 = vsub.f32 %v142_v44, %v144_v40  ;;  %v152_v49 = vadd.f32 %v151_v45, %v150_v43 }
 0x10c   :  { %v154_v50 = vsub.f32 %v152_v49, %v153_v46  ;;  %v159_v51 = vmul.f32 %v158_v47, %v145_v48 }
 0x10e   :  { %v160_v52 = vmul.f32 %v158_v47, %v154_v50  ;;  %v161_v53 = vmul.f32 %v159_v51, %v159_v51  ;;  %v167_v57 = vrot.slane %v159_v51, %v83_v22 }
 0x110   :  { %v162_v54 = vsub.f32 %v160_v52, %v161_v53  ;;  %v168_v59 = vsub.f32 %v135_v28, %v167_v57 }
 0x112   :  { %v163_v55 = vmax.f32 %v162_v54, 0.0 }
 0x114   :  { %v169_v56 = vadd.f32 1e-05, %v163_v55 }
 0x116   :  { %537 = vrsqrt.f32 %v169_v56 }
 0x123   :  { %v538_v58 = vpop.eup %537 }
 0x124   :  { %v174_v60 = vrot.slane %v538_v58, %v83_v22 }
 0x126   :  { %v175_v62 = vmul.f32 %v174_v60, %v168_v59 }
 0x128   :  { %v181_v1 = vmul.f32 %v420_v61, %v175_v62 }
 0x12a   :  { %v187_v2 = vadd.f32 %v421_v63, %v181_v1 }
 0x12c   :  { %v188_v3 = vpack.c.bf16 %v187_v2, %v187_v2 }
 0x12e   :  { %483 = vmatmul.mubr.bf16.vlgmr.msra.gmra.mxu1 %v188_v3 }
 0x1ee   :  { %v292_v7 = vpop.f32.mrf.mxu1 }
 0x1ef   :  { %v293_v8 = vadd.f32 %v422_v6, %v292_v7 }
 0x1f0   :  { %v484_v9 = vpop.f32.mrf.mxu1 }
 0x1f1   :  { %v298_v10 = vmax.f32 %v293_v8, 0.0 }
 0x1f2   :  { %v295_v11 = vpop.f32.mrf.mxu1 }
 0x1f3   :  { %v299_v12 = vpack.c.bf16 %v298_v10, %v298_v10 }
 0x1f4   :  { %v485_v13 = vpop.f32.mrf.mxu1 }
 0x1f5   :  { %503 = vmatmul.mubr.bf16.vlgmr.msra.gmra.mxu0 %v299_v12 }
 0x2b5   :  { %v403_v15 = vpop.f32.mrf.mxu0 }
 0x2b6   :  { %v404_v16 = vadd.f32 %v431_v14, %v403_v15 }
 0x2b7   :  { %v504_v17 = vpop.f32.mrf.mxu0 }
 0x2b8   :  { %539 = vtanh.f32 %v404_v16 }
 0x2b9   :  { %v406_v18 = vpop.f32.mrf.mxu0 }
 0x2bb   :  { %v505_v19 = vpop.f32.mrf.mxu0 }
 0x2c5   :  { %v540_v20 = vpop.eup %539 }
 0x2c6   :  { %410 = vst [vmem:[%s718_s5] sm:$0xff] %v540_v20 }
 0x2c7   :  { %415 = vsyncpa [#allocation4], 1 }
 0x2c8   :  { %416 = vsyncpa [#allocation6], 1 }
 0x2c9   :  { %417 = vsyncpa [#allocation9], 1 }

</bundles_post_ra>
